<compile_context>
chip_gen: v6e
topology: v6e:2x2x1
jax: 0.10.0
libtpu: 0.0.40
codegen_flags: <defaults>
</compile_context>

<pallas_src>
import functools

import jax
import jax.numpy as jnp
from jax.experimental import pallas as pl
from jax.experimental.pallas import tpu as pltpu


TM = 128  # batch tile (sublane-aligned; multiple of 128 feeds the MXU well)


def _mlp_feature_kernel(x_ref, w1_ref, b1_ref, w2_ref, b2_ref, f1_ref, f2_ref):
    """One batch tile of the MLP; hooked activations written to f1/f2.

    x/w are bf16 (MXU inputs), accumulation + epilogue in f32.
    fc3 is intentionally elided: FeatureExtractor discards the model output.
    """
    x = x_ref[...]  # (TM, D0) bf16

    # fc1 + ReLU  -> hooked feature "fc1"
    h1 = jnp.dot(x, w1_ref[...], preferred_element_type=jnp.float32)
    h1 = jnp.maximum(h1 + b1_ref[...], 0.0)
    f1_ref[...] = h1.astype(f1_ref.dtype)

    # fc2 + ReLU  -> hooked feature "fc2"
    h2 = jnp.dot(h1.astype(jnp.bfloat16), w2_ref[...],
                 preferred_element_type=jnp.float32)
    h2 = jnp.maximum(h2 + b2_ref[...], 0.0)
    f2_ref[...] = h2.astype(f2_ref.dtype)


@jax.jit
def feature_extractor_forward(x_nchw, params):
    """Mimics FeatureExtractor.forward: run the hooked model, return features."""
    B = x_nchw.shape[0]
    x_flat = x_nchw.reshape(B, -1)  # row-major flatten of (C, H, W)

    w1, b1, w2, b2, w3, b3 = params  # w3/b3 unused: fc3 output is discarded
    D0, H1 = w1.shape
    H2 = w2.shape[1]

    # bf16 MXU operands; biases stay f32 for the epilogue.
    x_bf = x_flat.astype(jnp.bfloat16)
    w1_bf = w1.astype(jnp.bfloat16)
    w2_bf = w2.astype(jnp.bfloat16)

    # Pad batch to a multiple of the tile so every block is full / lane-dense.
    n_tiles = pl.cdiv(B, TM)
    B_pad = n_tiles * TM
    if B_pad != B:
        x_bf = jnp.pad(x_bf, ((0, B_pad - B), (0, 0)))

    f1, f2 = pl.pallas_call(
        _mlp_feature_kernel,
        out_shape=(
            jax.ShapeDtypeStruct((B_pad, H1), jnp.float32),  # hooked "fc1"
            jax.ShapeDtypeStruct((B_pad, H2), jnp.float32),  # hooked "fc2"
        ),
        grid=(n_tiles,),
        in_specs=[
            pl.BlockSpec((TM, D0), lambda i: (i, 0)),   # x: tiled over batch
            pl.BlockSpec((D0, H1), lambda i: (0, 0)),   # w1: VMEM-resident
            pl.BlockSpec((1, H1), lambda i: (0, 0)),    # b1: VMEM-resident
            pl.BlockSpec((H1, H2), lambda i: (0, 0)),   # w2: VMEM-resident
            pl.BlockSpec((1, H2), lambda i: (0, 0)),    # b2: VMEM-resident
        ],
        out_specs=(
            pl.BlockSpec((TM, H1), lambda i: (i, 0)),
            pl.BlockSpec((TM, H2), lambda i: (i, 0)),
        ),
        compiler_params=pltpu.CompilerParams(
            dimension_semantics=("parallel",),  # 2x on v7x's dual TensorCores
        ),
    )(x_bf, w1_bf, b1, w2_bf, b2)

    # The dict of hooked features, exactly what FeatureExtractor.forward returns.
    return {"fc1": f1[:B], "fc2": f2[:B]}


def init_params(key, d_in, h1, h2, c_out):
    """Deterministic synthetic parameter init (Linear weights as (in, out))."""
    k1, k2, k3, k4, k5, k6 = jax.random.split(key, 6)
    w1 = jax.random.normal(k1, (d_in, h1), jnp.float32) * (1.0 / jnp.sqrt(d_in))
    b1 = jax.random.normal(k2, (1, h1), jnp.float32) * 0.01
    w2 = jax.random.normal(k3, (h1, h2), jnp.float32) * (1.0 / jnp.sqrt(h1))
    b2 = jax.random.normal(k4, (1, h2), jnp.float32) * 0.01
    w3 = jax.random.normal(k5, (h2, c_out), jnp.float32) * (1.0 / jnp.sqrt(h2))
    b3 = jax.random.normal(k6, (1, c_out), jnp.float32) * 0.01
    return (w1, b1, w2, b2, w3, b3)


if __name__ == "__main__":
    key = jax.random.PRNGKey(0)
    kx, kp = jax.random.split(key)

    # Small NCHW input, as a PyTorch model would receive.
    B, C, H, W = 2, 4, 16, 16
    x = jax.random.normal(kx, (B, C, H, W), jnp.float32)

    D0 = C * H * W        # 1024 flattened input features
    H1, H2, C_OUT = 128, 128, 16
    params = init_params(kp, D0, H1, H2, C_OUT)

    feats = feature_extractor_forward(x, params)
    jax.block_until_ready(feats)

    # Reference check in plain JAX with the same bf16-operand / f32-accumulate
    # math as the kernel.
    w1, b1, w2, b2, w3, b3 = params
    xf = x.reshape(B, -1)
    r1 = jnp.maximum(
        jnp.dot(xf.astype(jnp.bfloat16), w1.astype(jnp.bfloat16),
                preferred_element_type=jnp.float32) + b1, 0.0)
    r2 = jnp.maximum(
        jnp.dot(r1.astype(jnp.bfloat16), w2.astype(jnp.bfloat16),
                preferred_element_type=jnp.float32) + b2, 0.0)

    assert feats["fc1"].shape == (B, H1) and feats["fc2"].shape == (B, H2)
    assert jnp.allclose(feats["fc1"], r1, atol=1e-2, rtol=1e-2)
    assert jnp.allclose(feats["fc2"], r2, atol=1e-2, rtol=1e-2)

    print("KERNEL_OK")
</pallas_src>

<mosaic_0001>
module attributes {stable_mosaic.version = 11 : i64} {
  func.func @_mlp_feature_kernel(%arg0: i32, %arg1: memref<128x1024xbf16, #tpu.memory_space<vmem>>, %arg2: memref<1024x128xbf16, #tpu.memory_space<vmem>>, %arg3: memref<1x128xf32, #tpu.memory_space<vmem>>, %arg4: memref<128x128xbf16, #tpu.memory_space<vmem>>, %arg5: memref<1x128xf32, #tpu.memory_space<vmem>>, %arg6: memref<128x128xf32, #tpu.memory_space<vmem>>, %arg7: memref<128x128xf32, #tpu.memory_space<vmem>>) attributes {dimension_semantics = [#tpu.dimension_semantics<parallel>], iteration_bounds = array<i64: 1>, scalar_prefetch = 0 : i64, scratch_operands = 0 : i64, tpu.core_type = #tpu.core_type<tc>, window_params = [{transform_indices = @transform_0, window_bounds = array<i64: 128, 1024>}, {pipeline_mode = #tpu.pipeline_mode<synchronous>, transform_indices = @transform_1, window_bounds = array<i64: 1024, 128>}, {pipeline_mode = #tpu.pipeline_mode<synchronous>, transform_indices = @transform_2, window_bounds = array<i64: 1, 128>}, {pipeline_mode = #tpu.pipeline_mode<synchronous>, transform_indices = @transform_3, window_bounds = array<i64: 128, 128>}, {pipeline_mode = #tpu.pipeline_mode<synchronous>, transform_indices = @transform_4, window_bounds = array<i64: 1, 128>}, {transform_indices = @transform_5, window_bounds = array<i64: 128, 128>}, {transform_indices = @transform_6, window_bounds = array<i64: 128, 128>}]} {
    %c0 = arith.constant 0 : index
    %c0_0 = arith.constant 0 : index
    %0 = vector.load %arg1[%c0, %c0_0] : memref<128x1024xbf16, #tpu.memory_space<vmem>>, vector<128x1024xbf16>
    %c0_1 = arith.constant 0 : index
    %c0_2 = arith.constant 0 : index
    %1 = vector.load %arg2[%c0_1, %c0_2] : memref<1024x128xbf16, #tpu.memory_space<vmem>>, vector<1024x128xbf16>
    %cst = arith.constant dense<0.000000e+00> : vector<128x128xf32>
    %2 = tpu.matmul %0, %1, %cst {dimension_numbers = #tpu.dot_dimension_numbers<[1], [0], [0], [1], [0, 0, 1, 1], [], []>} : vector<128x1024xbf16>, vector<1024x128xbf16>, vector<128x128xf32> -> vector<128x128xf32>
    %c0_3 = arith.constant 0 : index
    %c0_4 = arith.constant 0 : index
    %3 = vector.load %arg3[%c0_3, %c0_4] : memref<1x128xf32, #tpu.memory_space<vmem>>, vector<1x128xf32>
    %4 = vector.broadcast %3 : vector<1x128xf32> to vector<128x128xf32>
    %5 = arith.addf %2, %4 : vector<128x128xf32>
    %cst_5 = arith.constant 0.000000e+00 : f32
    %6 = vector.broadcast %cst_5 : f32 to vector<128x128xf32>
    %7 = arith.maximumf %5, %6 : vector<128x128xf32>
    %c0_6 = arith.constant 0 : index
    %c0_7 = arith.constant 0 : index
    %8 = vector.load %arg6[%c0_6, %c0_7] : memref<128x128xf32, #tpu.memory_space<vmem>>, vector<128x128xf32>
    tpu.vector_store %arg6[%c0_6, %c0_7], %7 {strides = array<i32>} : memref<128x128xf32, #tpu.memory_space<vmem>>, vector<128x128xf32>,
    %9 = arith.truncf %7 : vector<128x128xf32> to vector<128x128xbf16>
    %c0_8 = arith.constant 0 : index
    %c0_9 = arith.constant 0 : index
    %10 = vector.load %arg4[%c0_8, %c0_9] : memref<128x128xbf16, #tpu.memory_space<vmem>>, vector<128x128xbf16>
    %cst_10 = arith.constant dense<0.000000e+00> : vector<128x128xf32>
    %11 = tpu.matmul %9, %10, %cst_10 {dimension_numbers = #tpu.dot_dimension_numbers<[1], [0], [0], [1], [0, 0, 1, 1], [], []>} : vector<128x128xbf16>, vector<128x128xbf16>, vector<128x128xf32> -> vector<128x128xf32>
    %c0_11 = arith.constant 0 : index
    %c0_12 = arith.constant 0 : index
    %12 = vector.load %arg5[%c0_11, %c0_12] : memref<1x128xf32, #tpu.memory_space<vmem>>, vector<1x128xf32>
    %13 = vector.broadcast %12 : vector<1x128xf32> to vector<128x128xf32>
    %14 = arith.addf %11, %13 : vector<128x128xf32>
    %cst_13 = arith.constant 0.000000e+00 : f32
    %15 = vector.broadcast %cst_13 : f32 to vector<128x128xf32>
    %16 = arith.maximumf %14, %15 : vector<128x128xf32>
    %c0_14 = arith.constant 0 : index
    %c0_15 = arith.constant 0 : index
    %17 = vector.load %arg7[%c0_14, %c0_15] : memref<128x128xf32, #tpu.memory_space<vmem>>, vector<128x128xf32>
    tpu.vector_store %arg7[%c0_14, %c0_15], %16 {strides = array<i32>} : memref<128x128xf32, #tpu.memory_space<vmem>>, vector<128x128xf32>,
    return
  }
  func.func @transform_0(%arg0: i32) -> (i32, i32) {
    %c0_i32 = arith.constant 0 : i32
    %c0_i32_0 = arith.constant 0 : i32
    return %arg0, %c0_i32 : i32, i32
  }
  func.func @transform_1(%arg0: i32) -> (i32, i32) {
    %c0_i32 = arith.constant 0 : i32
    %c0_i32_0 = arith.constant 0 : i32
    %c0_i32_1 = arith.constant 0 : i32
    return %c0_i32, %c0_i32_0 : i32, i32
  }
  func.func @transform_2(%arg0: i32) -> (i32, i32) {
    %c0_i32 = arith.constant 0 : i32
    %c0_i32_0 = arith.constant 0 : i32
    %c0_i32_1 = arith.constant 0 : i32
    return %c0_i32, %c0_i32_0 : i32, i32
  }
  func.func @transform_3(%arg0: i32) -> (i32, i32) {
    %c0_i32 = arith.constant 0 : i32
    %c0_i32_0 = arith.constant 0 : i32
    %c0_i32_1 = arith.constant 0 : i32
    return %c0_i32, %c0_i32_0 : i32, i32
  }
  func.func @transform_4(%arg0: i32) -> (i32, i32) {
    %c0_i32 = arith.constant 0 : i32
    %c0_i32_0 = arith.constant 0 : i32
    %c0_i32_1 = arith.constant 0 : i32
    return %c0_i32, %c0_i32_0 : i32, i32
  }
  func.func @transform_5(%arg0: i32) -> (i32, i32) {
    %c0_i32 = arith.constant 0 : i32
    %c0_i32_0 = arith.constant 0 : i32
    return %arg0, %c0_i32 : i32, i32
  }
  func.func @transform_6(%arg0: i32) -> (i32, i32) {
    %c0_i32 = arith.constant 0 : i32
    %c0_i32_0 = arith.constant 0 : i32
    return %arg0, %c0_i32 : i32, i32
  }
}

</mosaic_0001>

<bundles_post_ra>
// kernel: feature_extractor_forward.1
= control target key start
LH: loop header
LB: loop body
LE: loop exit
PB: predicated region body
PF: predicated region fallthrough
CT: control target
= control target key end

     0   :  { %s2838_s1 = inlined_call_operand.vmem [shape: bf16[1024,128], index: 1, kind: input, shape index: {}]   ;;  %s2839_s0 = inlined_call_operand.vmem [shape: bf16[128,1024], index: 0, kind: input, shape index: {}]   ;;  %s2840_s3 = inlined_call_operand.vmem [shape: bf16[128,128], index: 3, kind: input, shape index: {}]   ;;  %s2841_s2 = inlined_call_operand.vmem [shape: f32[1,128], index: 2, kind: input, shape index: {}]   ;;  %s2842_s5 = inlined_call_operand.vmem [shape: f32[128,128], index: 5, kind: output, shape index: {0}]   ;;  %s2843_s4 = inlined_call_operand.vmem [shape: f32[1,128], index: 4, kind: input, shape index: {}]   ;;  %s2844_s6 = inlined_call_operand.vmem [shape: f32[128,128], index: 6, kind: output, shape index: {1}]  }
   0x1   :  { %v2020_v0 = vld [vmem:[%s2838_s1 + $0x78] sm:$0xff]   ;;  %v2024_v4 = vld [vmem:[%s2838_s1 + $0x70] sm:$0xff]   ;;  %v2028_v8 = vld [vmem:[%s2838_s1 + $0x68] sm:$0xff]  }
   0x2   :  { %v2021_v1 = vld [vmem:[%s2838_s1 + $0xf8] sm:$0xff]   ;;  %1700 = vmatprep.subr.bf16.mxu0 %v2020_v0  ;;  %v2025_v5 = vld [vmem:[%s2838_s1 + $0xf0] sm:$0xff]   ;;  %v2029_v9 = vld [vmem:[%s2838_s1 + $0xe8] sm:$0xff]  }
   0x3   :  { %v2022_v2 = vld [vmem:[%s2838_s1 + $0x38] sm:$0xff]   ;;  %1764 = vmatprep.subr.bf16.mxu1 %v2021_v1  ;;  %v2026_v6 = vld [vmem:[%s2838_s1 + $0x30] sm:$0xff]   ;;  %v2030_v10 = vld [vmem:[%s2838_s1 + $0x28] sm:$0xff]  }
   0x4   :  { %v2023_v3 = vld [vmem:[%s2838_s1 + $0xb8] sm:$0xff]   ;;  %1701 = vmatpush3.bf16.msra.mxu0 %v2022_v2  ;;  %v2027_v7 = vld [vmem:[%s2838_s1 + $0xb0] sm:$0xff]   ;;  %v2031_v11 = vld [vmem:[%s2838_s1 + $0xa8] sm:$0xff]  }
   0x5   :  { %1765 = vmatpush3.bf16.msra.mxu1 %v2023_v3  ;;  %1702 = vmatprep.subr.bf16.mxu0 %v2024_v4  ;;  %v2032_v12 = vld [vmem:[%s2838_s1 + $0x60] sm:$0xff]   ;;  %v2036_v16 = vld [vmem:[%s2838_s1 + $0x58] sm:$0xff]   ;;  %v2040_v20 = vld [vmem:[%s2838_s1 + $0x50] sm:$0xff]  }
   0x6   :  { %1766 = vmatprep.subr.bf16.mxu1 %v2025_v5  ;;  %v2033_v13 = vld [vmem:[%s2838_s1 + $0xe0] sm:$0xff]   ;;  %v2037_v17 = vld [vmem:[%s2838_s1 + $0xd8] sm:$0xff]   ;;  %v2041_v21 = vld [vmem:[%s2838_s1 + $0xd0] sm:$0xff]  }
   0x7   :  { %v2034_v14 = vld [vmem:[%s2838_s1 + $0x20] sm:$0xff]   ;;  %v2038_v18 = vld [vmem:[%s2838_s1 + $0x18] sm:$0xff]   ;;  %v2042_v22 = vld [vmem:[%s2838_s1 + $0x10] sm:$0xff]  }
   0x8   :  { %1703 = vmatpush3.bf16.msra.mxu0 %v2026_v6  ;;  %v2035_v15 = vld [vmem:[%s2838_s1 + $0xa0] sm:$0xff]   ;;  %v2039_v19 = vld [vmem:[%s2838_s1 + $0x98] sm:$0xff]   ;;  %v2043_v23 = vld [vmem:[%s2838_s1 + $0x90] sm:$0xff]  }
   0x9   :  { %1767 = vmatpush3.bf16.msra.mxu1 %v2027_v7  ;;  %1704 = vmatprep.subr.bf16.mxu0 %v2028_v8  ;;  %v2044_v24 = vld [vmem:[%s2838_s1 + $0x48] sm:$0xff]   ;;  %v2048_v28 = vld [vmem:[%s2838_s1 + $0x40] sm:$0xff]   ;;  %v2052_v40 = vld [vmem:[%s2838_s1 + $0x178] sm:$0xff]  }
   0xa   :  { %1768 = vmatprep.subr.bf16.mxu1 %v2029_v9  ;;  %v2045_v25 = vld [vmem:[%s2838_s1 + $0xc8] sm:$0xff]   ;;  %v2049_v29 = vld [vmem:[%s2838_s1 + $0xc0] sm:$0xff]   ;;  %v2053_v41 = vld [vmem:[%s2838_s1 + $0x138] sm:$0xff]  }
   0xb   :  { %v2046_v26 = vld [vmem:[%s2838_s1 + $0x8] sm:$0xff]   ;;  %v2050_v30 = vld [vmem:[%s2838_s1] sm:$0xff]   ;;  %v2054_v42 = vld [vmem:[%s2838_s1 + $0x1f8] sm:$0xff]  }
   0xc   :  { %1705 = vmatpush3.bf16.msra.mxu0 %v2030_v10  ;;  %v2047_v27 = vld [vmem:[%s2838_s1 + $0x88] sm:$0xff]   ;;  %v2051_v31 = vld [vmem:[%s2838_s1 + $0x80] sm:$0xff]   ;;  %v2055_v43 = vld [vmem:[%s2838_s1 + $0x1b8] sm:$0xff]  }
   0xd   :  { %1769 = vmatpush3.bf16.msra.mxu1 %v2031_v11  ;;  %1706 = vmatprep.subr.bf16.mxu0 %v2032_v12  ;;  %v23_v32 = vld [vmem:[%s2839_s0] sm:$0xff]  ;;  %v24_v34 = vld [vmem:[%s2839_s0 + $0x8] sm:$0xff]  ;;  %v2056_v50 = vld [vmem:[%s2838_s1 + $0x170] sm:$0xff]  }
   0xe   :  { %1770 = vmatprep.subr.bf16.mxu1 %v2033_v13  ;;  %v27_v33 = vld [vmem:[%s2839_s0 + $0x20] sm:$0xff]  ;;  %v28_v37 = vld [vmem:[%s2839_s0 + $0x28] sm:$0xff]  ;;  %v2057_v52 = vld [vmem:[%s2838_s1 + $0x130] sm:$0xff]  }
   0xf   :  { %v1563_v35 = vcombine.low %v23_v32, %v27_v33  ;;  %v1564_v36 = vcombine.high %v23_v32, %v27_v33  ;;  %v1565_v38 = vcombine.low %v24_v34, %v28_v37  ;;  %v1566_v39 = vcombine.high %v24_v34, %v28_v37  ;;  %v31_v44 = vld [vmem:[%s2839_s0 + $0x40] sm:$0xff]  ;;  %v32_v47 = vld [vmem:[%s2839_s0 + $0x48] sm:$0xff]  ;;  %v2058_v54 = vld [vmem:[%s2838_s1 + $0x1f0] sm:$0xff]  }
  0x10   :  { %1707 = vmatpush3.bf16.msra.mxu0 %v2034_v14  ;;  %v35_v45 = vld [vmem:[%s2839_s0 + $0x60] sm:$0xff]  ;;  %v36_v48 = vld [vmem:[%s2839_s0 + $0x68] sm:$0xff]  ;;  %v2059_v55 = vld [vmem:[%s2838_s1 + $0x1b0] sm:$0xff]  }
  0x11   :  { %1771 = vmatpush3.bf16.msra.mxu1 %v2035_v15  ;;  %1708 = vmatprep.subr.bf16.mxu0 %v2036_v16  ;;  %v1572_v46 = vcombine.high %v31_v44, %v35_v45  ;;  %v1574_v49 = vcombine.high %v32_v47, %v36_v48  ;;  %v1571_v51 = vcombine.low %v31_v44, %v35_v45  ;;  %v39_v56 = vld [vmem:[%s2839_s0 + $0x80] sm:$0xff]  ;;  %v40_v58 = vld [vmem:[%s2839_s0 + $0x88] sm:$0xff]  ;;  %v2074_v32 = vld [vmem:[%s2838_s1 + $0x1d0] sm:$0xff]  }
  0x12   :  { %1772 = vmatprep.subr.bf16.mxu1 %v2037_v17  ;;  %958 = vmatprep.mubr.bf16.mxu0 %v1564_v36  ;;  %v1573_v53 = vcombine.low %v32_v47, %v36_v48  ;;  %v43_v57 = vld [vmem:[%s2839_s0 + $0xa0] sm:$0xff]  ;;  %v44_v59 = vld [vmem:[%s2839_s0 + $0xa8] sm:$0xff]  ;;  %v2075_v33 = vld [vmem:[%s2838_s1 + $0x190] sm:$0xff]  }
  0x13   :  { %1055 = vmatprep.mubr.bf16.mxu1 %v1566_v39  ;;  %v1580_v60 = vcombine.high %v39_v56, %v43_v57  ;;  %v1582_v61 = vcombine.high %v40_v58, %v44_v59  ;;  %v2060_v62 = vld [vmem:[%s2838_s1 + $0x168] sm:$0xff]   ;;  %v1579_v2 = vcombine.low %v39_v56, %v43_v57  ;;  %v47_v3 = vld [vmem:[%s2839_s0 + $0xc0] sm:$0xff]  ;;  %v1581_v6 = vcombine.low %v40_v58, %v44_v59 }
  0x14   :  { %1709 = vmatpush3.bf16.msra.mxu0 %v2038_v18  ;;  %v2061_v63 = vld [vmem:[%s2838_s1 + $0x128] sm:$0xff]   ;;  %v51_v4 = vld [vmem:[%s2839_s0 + $0xe0] sm:$0xff]  ;;  %v2068_v18 = vld [vmem:[%s2838_s1 + $0x158] sm:$0xff]  }
  0x15   :  { %1773 = vmatpush3.bf16.msra.mxu1 %v2039_v19  ;;  %1710 = vmatprep.subr.bf16.mxu0 %v2040_v20  ;;  %v2062_v0 = vld [vmem:[%s2838_s1 + $0x1e8] sm:$0xff]   ;;  %v1588_v7 = vcombine.high %v47_v3, %v51_v4  ;;  %v2064_v10 = vld [vmem:[%s2838_s1 + $0x160] sm:$0xff]   ;;  %v1587_v19 = vcombine.low %v47_v3, %v51_v4  ;;  %v2069_v20 = vld [vmem:[%s2838_s1 + $0x118] sm:$0xff]  }
  0x16   :  { %1774 = vmatprep.subr.bf16.mxu1 %v2041_v21  ;;  %v2063_v1 = vld [vmem:[%s2838_s1 + $0x1a8] sm:$0xff]   ;;  %v2065_v11 = vld [vmem:[%s2838_s1 + $0x120] sm:$0xff]  }
  0x17   :  { %v48_v5 = vld [vmem:[%s2839_s0 + $0xc8] sm:$0xff]  ;;  %v2066_v12 = vld [vmem:[%s2838_s1 + $0x1e0] sm:$0xff]  }
  0x18   :  { %1711 = vmatpush3.bf16.msra.mxu0 %v2042_v22  ;;  %v52_v8 = vld [vmem:[%s2839_s0 + $0xe8] sm:$0xff]  ;;  %v2067_v13 = vld [vmem:[%s2838_s1 + $0x1a0] sm:$0xff]  }
  0x19   :  { %1775 = vmatpush3.bf16.msra.mxu1 %v2043_v23  ;;  %1712 = vmatprep.subr.bf16.mxu0 %v2044_v24  ;;  %v1590_v9 = vcombine.high %v48_v5, %v52_v8  ;;  %v55_v14 = vld [vmem:[%s2839_s0 + $0x100] sm:$0xff]  ;;  %v56_v16 = vld [vmem:[%s2839_s0 + $0x108] sm:$0xff]  ;;  %v1589_v21 = vcombine.low %v48_v5, %v52_v8  ;;  %v2070_v23 = vld [vmem:[%s2838_s1 + $0x1d8] sm:$0xff]  }
  0x1a   :  { %1776 = vmatprep.subr.bf16.mxu1 %v2045_v25  ;;  %v59_v15 = vld [vmem:[%s2839_s0 + $0x120] sm:$0xff]  ;;  %v60_v17 = vld [vmem:[%s2839_s0 + $0x128] sm:$0xff]  ;;  %v2071_v25 = vld [vmem:[%s2838_s1 + $0x198] sm:$0xff]  }
  0x1b   :  { %v1596_v22 = vcombine.high %v55_v14, %v59_v15  ;;  %v1598_v24 = vcombine.high %v56_v16, %v60_v17  ;;  %v1595_v34 = vcombine.low %v55_v14, %v59_v15  ;;  %v2077_v39 = vld [vmem:[%s2838_s1 + $0x108] sm:$0xff]   ;;  %v2081_v48 = vld [vmem:[%s2838_s1 + $0x100] sm:$0xff]   ;;  %v34_v8 = vld [vmem:[%s2839_s0 + $0x58] sm:$0xff] }
  0x1c   :  { %1713 = vmatpush3.bf16.msra.mxu0 %v2046_v26  ;;  %v63_v26 = vld [vmem:[%s2839_s0 + $0x140] sm:$0xff]  ;;  %v72_v44 = vld [vmem:[%s2839_s0 + $0x188] sm:$0xff]  ;;  %v41_v14 = vld [vmem:[%s2839_s0 + $0x90] sm:$0xff] }
  0x1d   :  { %1777 = vmatpush3.bf16.msra.mxu1 %v2047_v27  ;;  %1714 = vmatprep.subr.bf16.mxu0 %v2048_v28  ;;  %v67_v27 = vld [vmem:[%s2839_s0 + $0x160] sm:$0xff]  ;;  %v2072_v28 = vld [vmem:[%s2838_s1 + $0x150] sm:$0xff]   ;;  %v76_v45 = vld [vmem:[%s2839_s0 + $0x1a8] sm:$0xff] }
  0x1e   :  { %1778 = vmatprep.subr.bf16.mxu1 %v2049_v29  ;;  %v64_v29 = vld [vmem:[%s2839_s0 + $0x148] sm:$0xff]  ;;  %v1604_v36 = vcombine.high %v63_v26, %v67_v27  ;;  %v1603_v47 = vcombine.low %v63_v26, %v67_v27  ;;  %v1613_v59 = vcombine.low %v72_v44, %v76_v45  ;;  %v45_v15 = vld [vmem:[%s2839_s0 + $0xb0] sm:$0xff] }
  0x1f   :  { %v80_v56 = vld [vmem:[%s2839_s0 + $0x1c8] sm:$0xff]  ;;  %v1583_v26 = vcombine.low %v41_v14, %v45_v15 }
  0x20   :  { %1715 = vmatpush3.bf16.msra.mxu0 %v2050_v30  ;;  %v68_v30 = vld [vmem:[%s2839_s0 + $0x168] sm:$0xff] }
  0x21   :  { %1779 = vmatpush3.bf16.msra.mxu1 %v2051_v31  ;;  %1828 = vmatprep.subr.bf16.mxu0 %v2052_v40  ;;  %v2073_v31 = vld [vmem:[%s2838_s1 + $0x110] sm:$0xff]   ;;  %v1606_v37 = vcombine.high %v64_v29, %v68_v30  ;;  %v2078_v40 = vld [vmem:[%s2838_s1 + $0x1c8] sm:$0xff]  }
  0x22   :  { %1892 = vmatprep.subr.bf16.mxu1 %v2054_v42  ;;  %v75_v42 = vld [vmem:[%s2839_s0 + $0x1a0] sm:$0xff]  ;;  %v84_v57 = vld [vmem:[%s2839_s0 + $0x1e8] sm:$0xff] }
  0x23   :  { %959 = vmatmul.mubr.bf16.vlgmr.msra.gmra.mxu0 %v1563_v35  ;;  %v1597_v35 = vcombine.low %v56_v16, %v60_v17  ;;  %v1621_v3 = vcombine.low %v80_v56, %v84_v57  ;;  %v42_v16 = vld [vmem:[%s2839_s0 + $0x98] sm:$0xff] }
  0x24   :  { %1056 = vmatmul.mubr.bf16.vlgmr.msra.gmra.mxu1 %v1565_v38  ;;  %1829 = vmatpush3.bf16.msra.mxu0 %v2053_v41  ;;  %v2076_v38 = vld [vmem:[%s2838_s1 + $0x148] sm:$0xff]   ;;  %v71_v41 = vld [vmem:[%s2839_s0 + $0x180] sm:$0xff]  ;;  %v46_v17 = vld [vmem:[%s2839_s0 + $0xb8] sm:$0xff] }
  0x25   :  { %1893 = vmatpush3.bf16.msra.mxu1 %v2055_v43  ;;  %966 = vmatprep.mubr.bf16.mxu0 %v1572_v46  ;;  %v2079_v43 = vld [vmem:[%s2838_s1 + $0x188] sm:$0xff]   ;;  %v2080_v46 = vld [vmem:[%s2838_s1 + $0x140] sm:$0xff]   ;;  %v1611_v58 = vcombine.low %v71_v41, %v75_v42  ;;  %v1585_v27 = vcombine.low %v42_v16, %v46_v17 }
  0x26   :  { %1063 = vmatprep.mubr.bf16.mxu1 %v1574_v49  ;;  %1830 = vmatprep.subr.bf16.mxu0 %v2056_v50  ;;  %v1605_v49 = vcombine.low %v64_v29, %v68_v30  ;;  %v1612_v50 = vcombine.high %v71_v41, %v75_v42  ;;  %v57_v30 = vld [vmem:[%s2839_s0 + $0x110] sm:$0xff]  ;;  %v70_v41 = vld [vmem:[%s2839_s0 + $0x178] sm:$0xff] }
  0x27   :  { %1894 = vmatprep.subr.bf16.mxu1 %v2058_v54  ;;  %v79_v54 = vld [vmem:[%s2839_s0 + $0x1c0] sm:$0xff] }
  0x28   :  { %1831 = vmatpush3.bf16.msra.mxu0 %v2057_v52  ;;  %v1614_v52 = vcombine.high %v72_v44, %v76_v45 }
  0x29   :  { %1895 = vmatpush3.bf16.msra.mxu1 %v2059_v55  ;;  %1832 = vmatprep.subr.bf16.mxu0 %v2060_v62  ;;  %v83_v55 = vld [vmem:[%s2839_s0 + $0x1e0] sm:$0xff]  ;;  %v25_v62 = vld [vmem:[%s2839_s0 + $0x10] sm:$0xff] }
  0x2a   :  { %1896 = vmatprep.subr.bf16.mxu1 %v2062_v0  ;;  %v26_v0 = vld [vmem:[%s2839_s0 + $0x18] sm:$0xff] }
  0x2b   :  { %967 = vmatmul.mubr.bf16.gmra.mxu0 %v1571_v51  ;;  %v2082_v51 = vld [vmem:[%s2838_s1 + $0x1c0] sm:$0xff]  }
  0x2c   :  { %1064 = vmatmul.mubr.bf16.gmra.mxu1 %v1573_v53  ;;  %974 = vmatprep.mubr.bf16.mxu0 %v1580_v60  ;;  %v2083_v53 = vld [vmem:[%s2838_s1 + $0x180] sm:$0xff]   ;;  %v1620_v60 = vcombine.high %v79_v54, %v83_v55 }
  0x2d   :  { %1071 = vmatprep.mubr.bf16.mxu1 %v1582_v61  ;;  %1833 = vmatpush3.bf16.msra.mxu0 %v2061_v63  ;;  %v1622_v61 = vcombine.high %v80_v56, %v84_v57  ;;  %v29_v63 = vld [vmem:[%s2839_s0 + $0x30] sm:$0xff]  ;;  %v82_v56 = vld [vmem:[%s2839_s0 + $0x1d8] sm:$0xff] }
  0x2e   :  { %1897 = vmatpush3.bf16.msra.mxu1 %v2063_v1  ;;  %1834 = vmatprep.subr.bf16.mxu0 %v2064_v10  ;;  %v30_v1 = vld [vmem:[%s2839_s0 + $0x38] sm:$0xff]  ;;  %v1568_v4 = vcombine.high %v25_v62, %v29_v63  ;;  %v1567_v10 = vcombine.low %v25_v62, %v29_v63 }
  0x2f   :  { %1898 = vmatprep.subr.bf16.mxu1 %v2066_v12  ;;  %v1570_v5 = vcombine.high %v26_v0, %v30_v1  ;;  %v86_v57 = vld [vmem:[%s2839_s0 + $0x1f8] sm:$0xff] }
  0x30   :  { %v1625_v63 = vcombine.low %v82_v56, %v86_v57 }
  0x31   :  { %1835 = vmatpush3.bf16.msra.mxu0 %v2065_v11  ;;  %v1569_v11 = vcombine.low %v26_v0, %v30_v1  ;;  %v2084_v0 = vld [vmem:[%s2840_s3 + $0x38] sm:$0xff]   ;;  %v2085_v1 = vld [vmem:[%s2840_s3 + $0x30] sm:$0xff]  }
  0x32   :  { %1899 = vmatpush3.bf16.msra.mxu1 %v2067_v13  ;;  %1836 = vmatprep.subr.bf16.mxu0 %v2068_v18 }
  0x33   :  { %975 = vmatmul.mubr.bf16.gmra.mxu0 %v1579_v2  ;;  %1900 = vmatprep.subr.bf16.mxu1 %v2070_v23  ;;  %v1619_v2 = vcombine.low %v79_v54, %v83_v55  ;;  %v53_v23 = vld [vmem:[%s2839_s0 + $0xf0] sm:$0xff] }
  0x34   :  { %1072 = vmatmul.mubr.bf16.gmra.mxu1 %v1581_v6  ;;  %982 = vmatprep.mubr.bf16.mxu0 %v1588_v7  ;;  %v33_v6 = vld [vmem:[%s2839_s0 + $0x50] sm:$0xff] }
  0x35   :  { %1079 = vmatprep.mubr.bf16.mxu1 %v1590_v9  ;;  %1837 = vmatpush3.bf16.msra.mxu0 %v2069_v20  ;;  %v37_v7 = vld [vmem:[%s2839_s0 + $0x70] sm:$0xff]  ;;  %v38_v9 = vld [vmem:[%s2839_s0 + $0x78] sm:$0xff]  ;;  %v1584_v20 = vcombine.high %v41_v14, %v45_v15 }
  0x36   :  { %1901 = vmatpush3.bf16.msra.mxu1 %v2071_v25  ;;  %1838 = vmatprep.subr.bf16.mxu0 %v2072_v28  ;;  %v1576_v12 = vcombine.high %v33_v6, %v37_v7  ;;  %v1578_v13 = vcombine.high %v34_v8, %v38_v9  ;;  %v1575_v18 = vcombine.low %v33_v6, %v37_v7  ;;  %v54_v25 = vld [vmem:[%s2839_s0 + $0xf8] sm:$0xff]  ;;  %v81_v54 = vld [vmem:[%s2839_s0 + $0x1d0] sm:$0xff]  ;;  %v2090_v6 = vld [vmem:[%s2840_s3 + $0x8] sm:$0xff]  }
  0x37   :  { %1902 = vmatprep.subr.bf16.mxu1 %v2074_v32  ;;  %v58_v32 = vld [vmem:[%s2839_s0 + $0x118] sm:$0xff]  ;;  %v85_v55 = vld [vmem:[%s2839_s0 + $0x1f0] sm:$0xff]  ;;  %v2091_v7 = vld [vmem:[%s2840_s3] sm:$0xff]  }
  0x38   :  { %v1623_v62 = vcombine.low %v81_v54, %v85_v55 }
  0x39   :  { %1839 = vmatpush3.bf16.msra.mxu0 %v2073_v31  ;;  %v61_v31 = vld [vmem:[%s2839_s0 + $0x130] sm:$0xff] }
  0x3a   :  { %1903 = vmatpush3.bf16.msra.mxu1 %v2075_v33  ;;  %1840 = vmatprep.subr.bf16.mxu0 %v2076_v38  ;;  %v62_v33 = vld [vmem:[%s2839_s0 + $0x138] sm:$0xff]  ;;  %v65_v38 = vld [vmem:[%s2839_s0 + $0x150] sm:$0xff]  ;;  %v1599_v42 = vcombine.low %v57_v30, %v61_v31 }
  0x3b   :  { %983 = vmatmul.mubr.bf16.gmra.mxu0 %v1587_v19  ;;  %1904 = vmatprep.subr.bf16.mxu1 %v2078_v40  ;;  %v1577_v19 = vcombine.low %v34_v8, %v38_v9  ;;  %v66_v40 = vld [vmem:[%s2839_s0 + $0x158] sm:$0xff] }
  0x3c   :  { %1080 = vmatmul.mubr.bf16.gmra.mxu1 %v1589_v21  ;;  %990 = vmatprep.mubr.bf16.mxu0 %v1596_v22  ;;  %v1586_v21 = vcombine.high %v42_v16, %v46_v17  ;;  %v49_v22 = vld [vmem:[%s2839_s0 + $0xd0] sm:$0xff]  ;;  %v1610_v45 = vcombine.high %v66_v40, %v70_v41 }
  0x3d   :  { %1087 = vmatprep.mubr.bf16.mxu1 %v1598_v24  ;;  %1841 = vmatpush3.bf16.msra.mxu0 %v2077_v39  ;;  %v50_v24 = vld [vmem:[%s2839_s0 + $0xd8] sm:$0xff]  ;;  %v1592_v28 = vcombine.high %v49_v22, %v53_v23  ;;  %v69_v39 = vld [vmem:[%s2839_s0 + $0x170] sm:$0xff] }
  0x3e   :  { %1905 = vmatpush3.bf16.msra.mxu1 %v2079_v43  ;;  %1842 = vmatprep.subr.bf16.mxu0 %v2080_v46  ;;  %v1594_v29 = vcombine.high %v50_v24, %v54_v25  ;;  %v1601_v43 = vcombine.low %v58_v32, %v62_v33  ;;  %v1608_v44 = vcombine.high %v65_v38, %v69_v39  ;;  %v73_v46 = vld [vmem:[%s2839_s0 + $0x190] sm:$0xff] }
  0x3f   :  { %1906 = vmatprep.subr.bf16.mxu1 %v2082_v51  ;;  %v1609_v51 = vcombine.low %v66_v40, %v70_v41 }
  0x41   :  { %1843 = vmatpush3.bf16.msra.mxu0 %v2081_v48  ;;  %v74_v48 = vld [vmem:[%s2839_s0 + $0x198] sm:$0xff] }
  0x42   :  { %1907 = vmatpush3.bf16.msra.mxu1 %v2083_v53  ;;  %1972 = vmatprep.subr.bf16.mxu0 %v2084_v0 }
  0x43   :  { %991 = vmatmul.mubr.bf16.gmra.mxu0 %v1595_v34  ;;  %v1591_v34 = vcombine.low %v49_v22, %v53_v23  ;;  %2004 = vmatprep.subr.bf16.mxu1 %v2084_v0 }
  0x44   :  { %1088 = vmatmul.mubr.bf16.gmra.mxu1 %v1597_v35  ;;  %998 = vmatprep.mubr.bf16.mxu0 %v1604_v36  ;;  %v1593_v35 = vcombine.low %v50_v24, %v54_v25  ;;  %v1600_v36 = vcombine.high %v57_v30, %v61_v31 }
  0x45   :  { %1095 = vmatprep.mubr.bf16.mxu1 %v1606_v37  ;;  %v1602_v37 = vcombine.high %v58_v32, %v62_v33 }
  0x4b   :  { %999 = vmatmul.mubr.bf16.gmra.mxu0 %v1603_v47  ;;  %v77_v47 = vld [vmem:[%s2839_s0 + $0x1b0] sm:$0xff] }
  0x4c   :  { %1096 = vmatmul.mubr.bf16.gmra.mxu1 %v1605_v49  ;;  %1006 = vmatprep.mubr.bf16.mxu0 %v1612_v50  ;;  %v78_v49 = vld [vmem:[%s2839_s0 + $0x1b8] sm:$0xff]  ;;  %v1607_v50 = vcombine.low %v65_v38, %v69_v39 }
  0x4d   :  { %1103 = vmatprep.mubr.bf16.mxu1 %v1614_v52  ;;  %v1616_v52 = vcombine.high %v73_v46, %v77_v47  ;;  %v1618_v53 = vcombine.high %v74_v48, %v78_v49 }
  0x53   :  { %1007 = vmatmul.mubr.bf16.gmra.mxu0 %v1611_v58  ;;  %v1615_v58 = vcombine.low %v73_v46, %v77_v47 }
  0x54   :  { %1104 = vmatmul.mubr.bf16.gmra.mxu1 %v1613_v59  ;;  %1014 = vmatprep.mubr.bf16.mxu0 %v1620_v60  ;;  %v1617_v59 = vcombine.low %v74_v48, %v78_v49  ;;  %v1624_v60 = vcombine.high %v81_v54, %v85_v55 }
  0x55   :  { %1111 = vmatprep.mubr.bf16.mxu1 %v1622_v61  ;;  %v1626_v61 = vcombine.high %v82_v56, %v86_v57 }
  0x5b   :  { %1015 = vmatmul.mubr.bf16.gmra.mxu0 %v1619_v2  ;;  %v2086_v2 = vld [vmem:[%s2840_s3 + $0x28] sm:$0xff]  }
  0x5c   :  { %1112 = vmatmul.mubr.bf16.gmra.mxu1 %v1621_v3  ;;  %1152 = vmatprep.mubr.bf16.mxu0 %v1568_v4  ;;  %v2087_v3 = vld [vmem:[%s2840_s3 + $0x20] sm:$0xff]   ;;  %v2088_v4 = vld [vmem:[%s2840_s3 + $0x18] sm:$0xff]  }
  0x5d   :  { %1249 = vmatprep.mubr.bf16.mxu1 %v1570_v5  ;;  %v2089_v5 = vld [vmem:[%s2840_s3 + $0x10] sm:$0xff]  }
  0x63   :  { %1153 = vmatmul.mubr.bf16.vlgmr.msra.gmra.mxu0 %v1567_v10 }
  0x64   :  { %1250 = vmatmul.mubr.bf16.vlgmr.msra.gmra.mxu1 %v1569_v11  ;;  %1160 = vmatprep.mubr.bf16.mxu0 %v1576_v12 }
  0x65   :  { %1257 = vmatprep.mubr.bf16.mxu1 %v1578_v13  ;;  %1973 = vmatpush3.bf16.msra.mxu0 %v2084_v0 }
  0x66   :  { %2012 = vmatpush3.bf16.msra.mxu1 %v2084_v0  ;;  %1974 = vmatprep.subr.bf16.mxu0 %v2085_v1 }
  0x67   :  { %2005 = vmatprep.subr.bf16.mxu1 %v2085_v1 }
  0x69   :  { %1975 = vmatpush3.bf16.msra.mxu0 %v2085_v1 }
  0x6a   :  { %2013 = vmatpush3.bf16.msra.mxu1 %v2085_v1  ;;  %1976 = vmatprep.subr.bf16.mxu0 %v2086_v2 }
  0x6b   :  { %1161 = vmatmul.mubr.bf16.gmra.mxu0 %v1575_v18  ;;  %2006 = vmatprep.subr.bf16.mxu1 %v2086_v2 }
  0x6c   :  { %1258 = vmatmul.mubr.bf16.gmra.mxu1 %v1577_v19  ;;  %1168 = vmatprep.mubr.bf16.mxu0 %v1584_v20 }
  0x6d   :  { %1265 = vmatprep.mubr.bf16.mxu1 %v1586_v21  ;;  %1977 = vmatpush3.bf16.msra.mxu0 %v2086_v2 }
  0x6e   :  { %2014 = vmatpush3.bf16.msra.mxu1 %v2086_v2  ;;  %1978 = vmatprep.subr.bf16.mxu0 %v2087_v3 }
  0x6f   :  { %2007 = vmatprep.subr.bf16.mxu1 %v2087_v3 }
  0x71   :  { %1979 = vmatpush3.bf16.msra.mxu0 %v2087_v3 }
  0x72   :  { %2015 = vmatpush3.bf16.msra.mxu1 %v2087_v3  ;;  %1980 = vmatprep.subr.bf16.mxu0 %v2088_v4 }
  0x73   :  { %1169 = vmatmul.mubr.bf16.gmra.mxu0 %v1583_v26  ;;  %2008 = vmatprep.subr.bf16.mxu1 %v2088_v4 }
  0x74   :  { %1266 = vmatmul.mubr.bf16.gmra.mxu1 %v1585_v27  ;;  %1176 = vmatprep.mubr.bf16.mxu0 %v1592_v28 }
  0x75   :  { %1273 = vmatprep.mubr.bf16.mxu1 %v1594_v29  ;;  %1981 = vmatpush3.bf16.msra.mxu0 %v2088_v4 }
  0x76   :  { %2016 = vmatpush3.bf16.msra.mxu1 %v2088_v4  ;;  %1982 = vmatprep.subr.bf16.mxu0 %v2089_v5 }
  0x77   :  { %2009 = vmatprep.subr.bf16.mxu1 %v2089_v5 }
  0x79   :  { %1983 = vmatpush3.bf16.msra.mxu0 %v2089_v5 }
  0x7a   :  { %2017 = vmatpush3.bf16.msra.mxu1 %v2089_v5  ;;  %1984 = vmatprep.subr.bf16.mxu0 %v2090_v6  ;;  %v2652_v5 = vld [vmem:[%s2841_s2] ss:$0 sm:$0xff] }
  0x7b   :  { %1177 = vmatmul.mubr.bf16.gmra.mxu0 %v1591_v34  ;;  %2010 = vmatprep.subr.bf16.mxu1 %v2090_v6 }
  0x7c   :  { %1274 = vmatmul.mubr.bf16.gmra.mxu1 %v1593_v35  ;;  %1184 = vmatprep.mubr.bf16.mxu0 %v1600_v36 }
  0x7d   :  { %1281 = vmatprep.mubr.bf16.mxu1 %v1602_v37  ;;  %1985 = vmatpush3.bf16.msra.mxu0 %v2090_v6 }
  0x7e   :  { %2018 = vmatpush3.bf16.msra.mxu1 %v2090_v6  ;;  %1986 = vmatprep.subr.bf16.mxu0 %v2091_v7 }
  0x7f   :  { %2011 = vmatprep.subr.bf16.mxu1 %v2091_v7 }
  0x81   :  { %1987 = vmatpush3.bf16.msra.mxu0 %v2091_v7 }
  0x82   :  { %2019 = vmatpush3.bf16.msra.mxu1 %v2091_v7 }
  0x83   :  { %1185 = vmatmul.mubr.bf16.gmra.mxu0 %v1599_v42 }
  0x84   :  { %1282 = vmatmul.mubr.bf16.gmra.mxu1 %v1601_v43  ;;  %1192 = vmatprep.mubr.bf16.mxu0 %v1608_v44 }
  0x85   :  { %1289 = vmatprep.mubr.bf16.mxu1 %v1610_v45 }
  0x8b   :  { %1193 = vmatmul.mubr.bf16.gmra.mxu0 %v1607_v50 }
  0x8c   :  { %1290 = vmatmul.mubr.bf16.gmra.mxu1 %v1609_v51  ;;  %1200 = vmatprep.mubr.bf16.mxu0 %v1616_v52 }
  0x8d   :  { %1297 = vmatprep.mubr.bf16.mxu1 %v1618_v53 }
  0x93   :  { %1201 = vmatmul.mubr.bf16.gmra.mxu0 %v1615_v58 }
  0x94   :  { %1298 = vmatmul.mubr.bf16.gmra.mxu1 %v1617_v59  ;;  %1208 = vmatprep.mubr.bf16.mxu0 %v1624_v60 }
  0x95   :  { %1305 = vmatprep.mubr.bf16.mxu1 %v1626_v61 }
  0x9b   :  { %1209 = vmatmul.mubr.bf16.gmra.mxu0 %v1623_v62 }
  0x9c   :  { %1306 = vmatmul.mubr.bf16.gmra.mxu1 %v1625_v63 }
  0xe3   :  { %v1716_v8 = vpop.f32.mrf.mxu0 }
  0xe4   :  { %v2535_v9 = vpop.f32.mrf.mxu1 }
  0xe5   :  { %v1717_v10 = vpop.f32.mrf.mxu0 }
  0xe6   :  { %v2537_v11 = vpop.f32.mrf.mxu1  ;;  %v1718_v3 = vadd.f32 %v1717_v10, %v1716_v8 }
  0xe7   :  { %v2539_v12 = vpop.f32.mrf.mxu0  ;;  %v1782_v10 = vadd.f32 %v2537_v11, %v2535_v9 }
  0xe8   :  { %v2541_v13 = vpop.f32.mrf.mxu1 }
  0xe9   :  { %v1720_v14 = vpop.f32.mrf.mxu0 }
  0xea   :  { %v2543_v15 = vpop.f32.mrf.mxu1 }
  0xeb   :  { %v2545_v16 = vpop.f32.mrf.mxu0 }
  0xec   :  { %v2547_v17 = vpop.f32.mrf.mxu1 }
  0xed   :  { %v2549_v18 = vpop.f32.mrf.mxu0 }
  0xee   :  { %v2551_v19 = vpop.f32.mrf.mxu1 }
  0xef   :  { %v2553_v20 = vpop.f32.mrf.mxu0 }
  0xf0   :  { %v2555_v21 = vpop.f32.mrf.mxu1 }
  0xf1   :  { %v2557_v22 = vpop.f32.mrf.mxu0 }
  0xf2   :  { %v2559_v23 = vpop.f32.mrf.mxu1  ;;  %v1727_v9 = vadd.f32 %v2557_v22, %v2553_v20 }
  0xf3   :  { %v2561_v24 = vpop.f32.mrf.mxu0 }
  0xf4   :  { %v2563_v25 = vpop.f32.mrf.mxu1 }
  0xf5   :  { %v2565_v26 = vpop.f32.mrf.mxu0 }
  0xf6   :  { %v2567_v27 = vpop.f32.mrf.mxu1  ;;  %v1730_v20 = vadd.f32 %v2565_v26, %v2561_v24 }
  0xf7   :  { %v2569_v28 = vpop.f32.mrf.mxu0 }
  0xf8   :  { %v2571_v29 = vpop.f32.mrf.mxu1  ;;  %v977_v26 = vadd.f32 %v1730_v20, %v2652_v5 }
  0xf9   :  { %v2573_v30 = vpop.f32.mrf.mxu0 }
  0xfa   :  { %v2575_v31 = vpop.f32.mrf.mxu1 }
  0xfb   :  { %v2577_v32 = vpop.f32.mrf.mxu0 }
  0xfc   :  { %v2579_v33 = vpop.f32.mrf.mxu1 }
  0xfd   :  { %v2581_v34 = vpop.f32.mrf.mxu0 }
  0xfe   :  { %v2583_v35 = vpop.f32.mrf.mxu1 }
  0xff   :  { %v2585_v36 = vpop.f32.mrf.mxu0 }
 0x100   :  { %v2587_v37 = vpop.f32.mrf.mxu1 }
 0x101   :  { %v2589_v38 = vpop.f32.mrf.mxu0 }
 0x102   :  { %v2591_v39 = vpop.f32.mrf.mxu1 }
 0x103   :  { %v2593_v40 = vpop.f32.mrf.mxu0 }
 0x104   :  { %v2595_v41 = vpop.f32.mrf.mxu1 }
 0x105   :  { %v2597_v42 = vpop.f32.mrf.mxu0 }
 0x106   :  { %v2599_v43 = vpop.f32.mrf.mxu1 }
 0x107   :  { %v2601_v44 = vpop.f32.mrf.mxu0 }
 0x108   :  { %v2603_v45 = vpop.f32.mrf.mxu1 }
 0x109   :  { %v2605_v46 = vpop.f32.mrf.mxu0 }
 0x10a   :  { %v2607_v47 = vpop.f32.mrf.mxu1 }
 0x10b   :  { %v2609_v48 = vpop.f32.mrf.mxu0 }
 0x10c   :  { %v2611_v49 = vpop.f32.mrf.mxu1 }
 0x10d   :  { %v2613_v50 = vpop.f32.mrf.mxu0 }
 0x10e   :  { %v2615_v51 = vpop.f32.mrf.mxu1 }
 0x10f   :  { %v2617_v52 = vpop.f32.mrf.mxu0 }
 0x110   :  { %v2619_v53 = vpop.f32.mrf.mxu1 }
 0x111   :  { %v2621_v54 = vpop.f32.mrf.mxu0 }
 0x112   :  { %v2623_v55 = vpop.f32.mrf.mxu1 }
 0x113   :  { %2845 = vst [vmem:[#allocation2_spill] sm:$0xff] %v2623_v55  ;;  %v2625_v56 = vpop.f32.mrf.mxu0 }
 0x114   :  { %v2627_v57 = vpop.f32.mrf.mxu1 }
 0x115   :  { %2846 = vst [vmem:[#allocation3_spill] sm:$0xff] %v2627_v57  ;;  %v2629_v58 = vpop.f32.mrf.mxu0 }
 0x116   :  { %v2631_v59 = vpop.f32.mrf.mxu1 }
 0x117   :  { %2847 = vst [vmem:[#allocation4_spill] sm:$0xff] %v2631_v59  ;;  %v2633_v60 = vpop.f32.mrf.mxu0 }
 0x118   :  { %2848 = vst [vmem:[#allocation5_spill] sm:$0xff] %v2633_v60  ;;  %v2635_v61 = vpop.f32.mrf.mxu1 }
 0x119   :  { %2849 = vst [vmem:[#allocation6_spill] sm:$0xff] %v2635_v61  ;;  %v2637_v62 = vpop.f32.mrf.mxu0 }
 0x11a   :  { %2850 = vst [vmem:[#allocation7_spill] sm:$0xff] %v2637_v62  ;;  %v2639_v63 = vpop.f32.mrf.mxu1 }
 0x11b   :  { %2851 = vst [vmem:[#allocation8_spill] sm:$0xff] %v2639_v63  ;;  %v2641_v0 = vpop.f32.mrf.mxu0  ;;  %v961_v63 = vadd.f32 %v1718_v3, %v2652_v5 }
 0x11c   :  { %2852 = vst [vmem:[#allocation9_spill] sm:$0xff] %v2641_v0  ;;  %v2643_v1 = vpop.f32.mrf.mxu1 }
 0x11d   :  { %2853 = vst [vmem:[#allocation10_spill] sm:$0xff] %v2643_v1  ;;  %v2645_v2 = vpop.f32.mrf.mxu0  ;;  %v1721_v1 = vadd.f32 %v1720_v14, %v2539_v12  ;;  %v1058_v59 = vadd.f32 %v1782_v10, %v961_v63  ;;  %v1785_v12 = vadd.f32 %v2543_v15, %v2541_v13 }
 0x11e   :  { %2854 = vst [vmem:[#allocation11_spill] sm:$0xff] %v2645_v2  ;;  %v2647_v4 = vpop.f32.mrf.mxu1 }
 0x11f   :  { %2855 = vst [vmem:[#allocation12_spill] sm:$0xff] %v2647_v4  ;;  %v2654_v6 = vpop.f32.mrf.mxu0  ;;  %v964_v57 = vadd.f32 %v1721_v1, %v2652_v5 }
 0x120   :  { %2856 = vst [vmem:[#allocation13_spill] sm:$0xff] %v2654_v6  ;;  %v2656_v7 = vpop.f32.mrf.mxu1 }
 0x121   :  { %2857 = vst [vmem:[#allocation14_spill] sm:$0xff] %v2656_v7  ;;  %v2658_v61 = vpop.f32.mrf.mxu0  ;;  %v1724_v7 = vadd.f32 %v2549_v18, %v2545_v16  ;;  %v1061_v60 = vadd.f32 %v1785_v12, %v964_v57  ;;  %v1788_v18 = vadd.f32 %v2551_v19, %v2547_v17  ;;  %v1791_v17 = vadd.f32 %v2559_v23, %v2555_v21 }
 0x122   :  { %2858 = vst [vmem:[#allocation15_spill] sm:$0xff] %v2658_v61  ;;  %v2662_v0 = vpop.f32.mrf.mxu1  ;;  %v1733_v12 = vadd.f32 %v2573_v30, %v2569_v28 }
 0x123   :  { %2859 = vst [vmem:[#allocation16_spill] sm:$0xff] %v2662_v0  ;;  %v1844_v8 = vpop.f32.mrf.mxu0  ;;  %v969_v63 = vadd.f32 %v1724_v7, %v2652_v5 }
 0x124   :  { %v1908_v4 = vpop.f32.mrf.mxu1  ;;  %v980_v28 = vadd.f32 %v1733_v12, %v2652_v5 }
 0x125   :  { %v1845_v2 = vpop.f32.mrf.mxu0 }
 0x126   :  { %v1846_v6 = vadd.f32 %v1845_v2, %v1844_v8  ;;  %v1909_v61 = vpop.f32.mrf.mxu1 }
 0x127   :  { %v1847_v62 = vpop.f32.mrf.mxu0  ;;  %v1910_v3 = vadd.f32 %v1909_v61, %v1908_v4  ;;  %v1066_v4 = vadd.f32 %v1788_v18, %v969_v63 }
 0x128   :  { %v1155_v14 = vadd.f32 %v1846_v6, %v1058_v59  ;;  %v1911_v0 = vpop.f32.mrf.mxu1  ;;  %v972_v59 = vadd.f32 %v1727_v9, %v2652_v5 }
 0x129   :  { %v1848_v11 = vpop.f32.mrf.mxu0 }
 0x12a   :  { %v1252_v1 = vadd.f32 %v1910_v3, %v1155_v14  ;;  %v1849_v10 = vadd.f32 %v1848_v11, %v1847_v62  ;;  %v1912_v55 = vpop.f32.mrf.mxu1  ;;  %v1069_v7 = vadd.f32 %v1791_v17, %v972_v59  ;;  %v1794_v11 = vadd.f32 %v2567_v27, %v2563_v25 }
 0x12b   :  { %v1850_v16 = vpop.f32.mrf.mxu0  ;;  %v1913_v13 = vadd.f32 %v1912_v55, %v1911_v0  ;;  %v1797_v25 = vadd.f32 %v2575_v31, %v2571_v29 }
 0x12c   :  { %v1314_v2 = vmax.f32 %v1252_v1, 0.0  ;;  %v1158_v8 = vadd.f32 %v1849_v10, %v1061_v60  ;;  %v1914_v15 = vpop.f32.mrf.mxu1  ;;  %v1074_v18 = vadd.f32 %v1794_v11, %v977_v26 }
 0x12d   :  { %v1851_v61 = vpop.f32.mrf.mxu0 }
 0x12e   :  { %1330 = vst [vmem:[%s2842_s5] sm:$0xff] %v1314_v2  ;;  %v1255_v22 = vadd.f32 %v1913_v13, %v1158_v8  ;;  %v1852_v57 = vadd.f32 %v1851_v61, %v1850_v16  ;;  %v1915_v62 = vpop.f32.mrf.mxu1  ;;  %v1736_v8 = vadd.f32 %v2581_v34, %v2577_v32 }
 0x12f   :  { %v1853_v19 = vpop.f32.mrf.mxu0  ;;  %v1916_v0 = vadd.f32 %v1915_v62, %v1914_v15 }
 0x130   :  { %v1315_v55 = vmax.f32 %v1255_v22, 0.0  ;;  %v1163_v60 = vadd.f32 %v1852_v57, %v1066_v4  ;;  %v1917_v6 = vpop.f32.mrf.mxu1  ;;  %v1077_v22 = vadd.f32 %v1797_v25, %v980_v28  ;;  %v1739_v57 = vadd.f32 %v2589_v38, %v2585_v36 }
 0x131   :  { %v1854_v24 = vpop.f32.mrf.mxu0  ;;  %v985_v34 = vadd.f32 %v1736_v8, %v2652_v5  ;;  %v1748_v25 = vadd.f32 %v2613_v50, %v2609_v48 }
 0x132   :  { %1331 = vst [vmem:[%s2842_s5 + $0x8] sm:$0xff] %v1315_v55  ;;  %v1260_v14 = vadd.f32 %v1916_v0, %v1163_v60  ;;  %v1855_v3 = vadd.f32 %v1854_v24, %v1853_v19  ;;  %v1918_v9 = vpop.f32.mrf.mxu1  ;;  %v1346_v21 = vpack.c.bf16 %v1315_v55, %v1314_v2  ;;  %v1800_v55 = vadd.f32 %v2583_v35, %v2579_v33 }
 0x133   :  { %v1856_v23 = vpop.f32.mrf.mxu0  ;;  %v1919_v10 = vadd.f32 %v1918_v9, %v1917_v6  ;;  %v988_v36 = vadd.f32 %v1739_v57, %v2652_v5  ;;  %v1742_v24 = vadd.f32 %v2597_v42, %v2593_v40  ;;  %v1803_v33 = vadd.f32 %v2591_v39, %v2587_v37 }
 0x134   :  { %v1316_v63 = vmax.f32 %v1260_v14, 0.0  ;;  %v1166_v1 = vadd.f32 %v1855_v3, %v1069_v7  ;;  %v1920_v16 = vpop.f32.mrf.mxu1  ;;  %1988 = vmatprep.mubr.bf16.mxu0 %v1346_v21  ;;  %v1082_v12 = vadd.f32 %v1800_v55, %v985_v34  ;;  %v1751_v34 = vadd.f32 %v2621_v54, %v2617_v52 }
 0x135   :  { %v1857_v30 = vpop.f32.mrf.mxu0  ;;  %v993_v42 = vadd.f32 %v1742_v24, %v2652_v5  ;;  %v1001_v50 = vadd.f32 %v1748_v25, %v2652_v5 }
 0x136   :  { %1332 = vst [vmem:[%s2842_s5 + $0x10] sm:$0xff] %v1316_v63  ;;  %v1263_v2 = vadd.f32 %v1919_v10, %v1166_v1  ;;  %v1858_v13 = vadd.f32 %v1857_v30, %v1856_v23  ;;  %v1921_v15 = vpop.f32.mrf.mxu1  ;;  %v1745_v1 = vadd.f32 %v2605_v46, %v2601_v44  ;;  %v1806_v30 = vadd.f32 %v2599_v43, %v2595_v41 }
 0x137   :  { %v1859_v27 = vpop.f32.mrf.mxu0  ;;  %v1922_v4 = vadd.f32 %v1921_v15, %v1920_v16  ;;  %v1809_v41 = vadd.f32 %v2607_v47, %v2603_v45  ;;  %v1004_v52 = vadd.f32 %v1751_v34, %v2652_v5 }
 0x138   :  { %v1317_v59 = vmax.f32 %v1263_v2, 0.0  ;;  %v1171_v61 = vadd.f32 %v1858_v13, %v1074_v18  ;;  %v1923_v20 = vpop.f32.mrf.mxu1  ;;  %v996_v44 = vadd.f32 %v1745_v1, %v2652_v5  ;;  %v1090_v15 = vadd.f32 %v1806_v30, %v993_v42  ;;  %v2863_v42 = vld [vmem:[#allocation3_spill] sm:$0xff] }
 0x139   :  { %v1860_v32 = vpop.f32.mrf.mxu0 }
 0x13a   :  { %1333 = vst [vmem:[%s2842_s5 + $0x18] sm:$0xff] %v1317_v59  ;;  %v1347_v62 = vpack.c.bf16 %v1317_v59, %v1316_v63  ;;  %v1268_v17 = vadd.f32 %v1922_v4, %v1171_v61  ;;  %v1861_v19 = vadd.f32 %v1860_v32, %v1859_v27  ;;  %v1924_v29 = vpop.f32.mrf.mxu1  ;;  %v1085_v63 = vadd.f32 %v1803_v33, %v988_v36 }
 0x13b   :  { %v1862_v31 = vpop.f32.mrf.mxu0  ;;  %v1925_v6 = vadd.f32 %v1924_v29, %v1923_v20  ;;  %v1093_v32 = vadd.f32 %v1809_v41, %v996_v44  ;;  %v1812_v29 = vadd.f32 %v2615_v51, %v2611_v49  ;;  %v2860_v49 = vld [vmem:[#allocation2_spill] sm:$0xff] }
 0x13c   :  { %v1318_v60 = vmax.f32 %v1268_v17, 0.0  ;;  %v1174_v0 = vadd.f32 %v1861_v19, %v1077_v22  ;;  %v1926_v7 = vpop.f32.mrf.mxu1  ;;  %1989 = vmatmul.mubr.bf16.vlgmr.msra.gmra.mxu0 %v1347_v62  ;;  %v1815_v51 = vadd.f32 %v2860_v49, %v2619_v53 }
 0x13d   :  { %v1863_v38 = vpop.f32.mrf.mxu0 }
 0x13e   :  { %1334 = vst [vmem:[%s2842_s5 + $0x20] sm:$0xff] %v1318_v60  ;;  %v1271_v26 = vadd.f32 %v1925_v6, %v1174_v0  ;;  %v1864_v14 = vadd.f32 %v1863_v38, %v1862_v31  ;;  %v1927_v3 = vpop.f32.mrf.mxu1  ;;  %v1098_v6 = vadd.f32 %v1812_v29, %v1001_v50  ;;  %v2869_v50 = vld [vmem:[#allocation13_spill] sm:$0xff] }
 0x13f   :  { %v1865_v35 = vpop.f32.mrf.mxu0  ;;  %v1928_v23 = vadd.f32 %v1927_v3, %v1926_v7  ;;  %v1754_v7 = vadd.f32 %v2629_v58, %v2625_v56 }
 0x140   :  { %v1319_v9 = vmax.f32 %v1271_v26, 0.0  ;;  %v1179_v21 = vadd.f32 %v1864_v14, %v1082_v12  ;;  %v1929_v11 = vpop.f32.mrf.mxu1 }
 0x141   :  { %v1866_v40 = vpop.f32.mrf.mxu0  ;;  %v1009_v58 = vadd.f32 %v1754_v7, %v2652_v5 }
 0x142   :  { %1335 = vst [vmem:[%s2842_s5 + $0x28] sm:$0xff] %v1319_v9  ;;  %v1276_v10 = vadd.f32 %v1928_v23, %v1179_v21  ;;  %v1867_v16 = vadd.f32 %v1866_v40, %v1865_v35  ;;  %v1930_v28 = vpop.f32.mrf.mxu1  ;;  %v1348_v37 = vpack.c.bf16 %v1319_v9, %v1318_v60  ;;  %v1101_v35 = vadd.f32 %v1815_v51, %v1004_v52  ;;  %v2861_v9 = vld [vmem:[#allocation5_spill] sm:$0xff]  ;;  %v2862_v21 = vld [vmem:[#allocation7_spill] sm:$0xff] }
 0x143   :  { %v1868_v39 = vpop.f32.mrf.mxu0  ;;  %v1931_v2 = vadd.f32 %v1930_v28, %v1929_v11  ;;  %v1757_v23 = vadd.f32 %v2862_v21, %v2861_v9 }
 0x144   :  { %v1320_v18 = vmax.f32 %v1276_v10, 0.0  ;;  %v1182_v8 = vadd.f32 %v1867_v16, %v1085_v63  ;;  %v1932_v13 = vpop.f32.mrf.mxu1  ;;  %1992 = vmatprep.mubr.bf16.mxu0 %v1348_v37  ;;  %v2864_v10 = vld [vmem:[#allocation4_spill] sm:$0xff] }
 0x145   :  { %v1869_v46 = vpop.f32.mrf.mxu0  ;;  %v1818_v16 = vadd.f32 %v2864_v10, %v2863_v42 }
 0x146   :  { %1336 = vst [vmem:[%s2842_s5 + $0x30] sm:$0xff] %v1320_v18  ;;  %v1279_v27 = vadd.f32 %v1931_v2, %v1182_v8  ;;  %v1870_v59 = vadd.f32 %v1869_v46, %v1868_v39  ;;  %v1933_v61 = vpop.f32.mrf.mxu1  ;;  %v2865_v8 = vld [vmem:[#allocation9_spill] sm:$0xff]  ;;  %v2866_v2 = vld [vmem:[#allocation11_spill] sm:$0xff] }
 0x147   :  { %v1871_v43 = vpop.f32.mrf.mxu0  ;;  %v1934_v22 = vadd.f32 %v1933_v61, %v1932_v13  ;;  %v1760_v13 = vadd.f32 %v2866_v2, %v2865_v8  ;;  %v1106_v46 = vadd.f32 %v1818_v16, %v1009_v58  ;;  %v2868_v61 = vld [vmem:[#allocation8_spill] sm:$0xff] }
 0x148   :  { %v1321_v4 = vmax.f32 %v1279_v27, 0.0  ;;  %v1187_v20 = vadd.f32 %v1870_v59, %v1090_v15  ;;  %v1935_v57 = vpop.f32.mrf.mxu1  ;;  %v2867_v59 = vld [vmem:[#allocation6_spill] sm:$0xff] }
 0x149   :  { %v1872_v48 = vpop.f32.mrf.mxu0  ;;  %v1821_v41 = vadd.f32 %v2868_v61, %v2867_v59  ;;  %v1017_v34 = vadd.f32 %v1760_v13, %v2652_v5 }
 0x14a   :  { %1337 = vst [vmem:[%s2842_s5 + $0x38] sm:$0xff] %v1321_v4  ;;  %v1284_v62 = vadd.f32 %v1934_v22, %v1187_v20  ;;  %v1873_v17 = vadd.f32 %v1872_v48, %v1871_v43  ;;  %v1936_v19 = vpop.f32.mrf.mxu1  ;;  %v1349_v45 = vpack.c.bf16 %v1321_v4, %v1320_v18  ;;  %v1012_v18 = vadd.f32 %v1757_v23, %v2652_v5 }
 0x14b   :  { %v1874_v47 = vpop.f32.mrf.mxu0  ;;  %v1937_v60 = vadd.f32 %v1936_v19, %v1935_v57 }
 0x14c   :  { %v1322_v31 = vmax.f32 %v1284_v62, 0.0  ;;  %v1190_v55 = vadd.f32 %v1873_v17, %v1093_v32  ;;  %v1938_v0 = vpop.f32.mrf.mxu1  ;;  %1993 = vmatmul.mubr.bf16.gmra.mxu0 %v1349_v45  ;;  %v1109_v32 = vadd.f32 %v1821_v41, %v1012_v18  ;;  %v2870_v62 = vld [vmem:[#allocation15_spill] sm:$0xff] }
 0x14d   :  { %v1875_v54 = vpop.f32.mrf.mxu0  ;;  %v1763_v17 = vadd.f32 %v2870_v62, %v2869_v50 }
 0x14e   :  { %1338 = vst [vmem:[%s2842_s5 + $0x40] sm:$0xff] %v1322_v31  ;;  %v1287_v36 = vadd.f32 %v1937_v60, %v1190_v55  ;;  %v1876_v38 = vadd.f32 %v1875_v54, %v1874_v47  ;;  %v1939_v12 = vpop.f32.mrf.mxu1  ;;  %v2871_v55 = vld [vmem:[#allocation10_spill] sm:$0xff]  ;;  %v2872_v60 = vld [vmem:[#allocation12_spill] sm:$0xff] }
 0x14f   :  { %v1877_v24 = vpop.f32.mrf.mxu0  ;;  %v1940_v3 = vadd.f32 %v1939_v12, %v1938_v0  ;;  %v1824_v0 = vadd.f32 %v2872_v60, %v2871_v55  ;;  %v1020_v12 = vadd.f32 %v1763_v17, %v2652_v5 }
 0x150   :  { %v1323_v26 = vmax.f32 %v1287_v36, 0.0  ;;  %v1195_v14 = vadd.f32 %v1876_v38, %v1098_v6  ;;  %v1941_v33 = vpop.f32.mrf.mxu1 }
 0x151   :  { %v1878_v56 = vpop.f32.mrf.mxu0  ;;  %v1114_v38 = vadd.f32 %v1824_v0, %v1017_v34 }
 0x152   :  { %1339 = vst [vmem:[%s2842_s5 + $0x48] sm:$0xff] %v1323_v26  ;;  %v1292_v11 = vadd.f32 %v1940_v3, %v1195_v14  ;;  %v1879_v63 = vadd.f32 %v1878_v56, %v1877_v24  ;;  %v1942_v1 = vpop.f32.mrf.mxu1  ;;  %v1350_v53 = vpack.c.bf16 %v1323_v26, %v1322_v31  ;;  %v2873_v14 = vld [vmem:[#allocation14_spill] sm:$0xff]  ;;  %v2874_v3 = vld [vmem:[#allocation16_spill] sm:$0xff] }
 0x153   :  { %v1880_v40 = vpop.f32.mrf.mxu0  ;;  %v1943_v39 = vadd.f32 %v1942_v1, %v1941_v33  ;;  %v1827_v33 = vadd.f32 %v2874_v3, %v2873_v14 }
 0x154   :  { %v1324_v28 = vmax.f32 %v1292_v11, 0.0  ;;  %v1198_v37 = vadd.f32 %v1879_v63, %v1101_v35  ;;  %v1944_v30 = vpop.f32.mrf.mxu1  ;;  %1996 = vmatprep.mubr.bf16.mxu1 %v1350_v53 }
 0x155   :  { %v1881_v44 = vpop.f32.mrf.mxu0  ;;  %v1117_v58 = vadd.f32 %v1827_v33, %v1020_v12 }
 0x156   :  { %1340 = vst [vmem:[%s2842_s5 + $0x50] sm:$0xff] %v1324_v28  ;;  %v1295_v15 = vadd.f32 %v1943_v39, %v1198_v37  ;;  %v1882_v25 = vadd.f32 %v1881_v44, %v1880_v40  ;;  %v1945_v27 = vpop.f32.mrf.mxu1  ;;  %v1691_v37 = vld [vmem:[%s2843_s4] ss:$0 sm:$0xff] }
 0x157   :  { %v1883_v43 = vpop.f32.mrf.mxu0  ;;  %v1946_v22 = vadd.f32 %v1945_v27, %v1944_v30 }
 0x158   :  { %v1325_v4 = vmax.f32 %v1295_v15, 0.0  ;;  %v1203_v20 = vadd.f32 %v1882_v25, %v1106_v46  ;;  %v1947_v57 = vpop.f32.mrf.mxu1 }
 0x159   :  { %v1884_v48 = vpop.f32.mrf.mxu0 }
 0x15a   :  { %1341 = vst [vmem:[%s2842_s5 + $0x58] sm:$0xff] %v1325_v4  ;;  %v1351_v19 = vpack.c.bf16 %v1325_v4, %v1324_v28  ;;  %v1300_v45 = vadd.f32 %v1946_v22, %v1203_v20  ;;  %v1885_v47 = vadd.f32 %v1884_v48, %v1883_v43  ;;  %v1948_v29 = vpop.f32.mrf.mxu1 }
 0x15b   :  { %v1886_v31 = vpop.f32.mrf.mxu0  ;;  %v1949_v6 = vadd.f32 %v1948_v29, %v1947_v57 }
 0x15c   :  { %v1326_v52 = vmax.f32 %v1300_v45, 0.0  ;;  %v1206_v54 = vadd.f32 %v1885_v47, %v1109_v32  ;;  %v1950_v7 = vpop.f32.mrf.mxu1  ;;  %1997 = vmatmul.mubr.bf16.vlgmr.msra.gmra.mxu1 %v1351_v19 }
 0x15d   :  { %v1887_v36 = vpop.f32.mrf.mxu0 }
 0x15e   :  { %1342 = vst [vmem:[%s2842_s5 + $0x60] sm:$0xff] %v1326_v52  ;;  %v1303_v49 = vadd.f32 %v1949_v6, %v1206_v54  ;;  %v1888_v51 = vadd.f32 %v1887_v36, %v1886_v31  ;;  %v1951_v24 = vpop.f32.mrf.mxu1 }
 0x15f   :  { %v1889_v26 = vpop.f32.mrf.mxu0  ;;  %v1952_v21 = vadd.f32 %v1951_v24, %v1950_v7 }
 0x160   :  { %v1327_v35 = vmax.f32 %v1303_v49, 0.0  ;;  %v1211_v9 = vadd.f32 %v1888_v51, %v1114_v38  ;;  %v1953_v23 = vpop.f32.mrf.mxu1 }
 0x161   :  { %v1890_v56 = vpop.f32.mrf.mxu0 }
 0x162   :  { %1343 = vst [vmem:[%s2842_s5 + $0x68] sm:$0xff] %v1327_v35  ;;  %v1308_v5 = vadd.f32 %v1952_v21, %v1211_v9  ;;  %v1891_v11 = vadd.f32 %v1890_v56, %v1889_v26  ;;  %v1954_v63 = vpop.f32.mrf.mxu1  ;;  %v1352_v1 = vpack.c.bf16 %v1327_v35, %v1326_v52 }
 0x163   :  { %v1955_v42 = vadd.f32 %v1954_v63, %v1953_v23 }
 0x164   :  { %v1328_v53 = vmax.f32 %v1308_v5, 0.0  ;;  %v1214_v40 = vadd.f32 %v1891_v11, %v1117_v58  ;;  %2000 = vmatprep.mubr.bf16.mxu1 %v1352_v1 }
 0x166   :  { %1344 = vst [vmem:[%s2842_s5 + $0x70] sm:$0xff] %v1328_v53  ;;  %v1311_v10 = vadd.f32 %v1955_v42, %v1214_v40 }
 0x168   :  { %v1329_v16 = vmax.f32 %v1311_v10, 0.0 }
 0x16a   :  { %1345 = vst [vmem:[%s2842_s5 + $0x78] sm:$0xff] %v1329_v16  ;;  %v1353_v28 = vpack.c.bf16 %v1329_v16, %v1328_v53 }
 0x16c   :  { %2001 = vmatmul.mubr.bf16.gmra.mxu1 %v1353_v28 }
 0x1fc   :  { %v1990_v39 = vpop.f32.mrf.mxu0 }
 0x1fd   :  { %v1468_v30 = vadd.f32 %v1990_v39, %v1691_v37 }
 0x1fe   :  { %v1459_v18 = vpop.f32.mrf.mxu0 }
 0x1ff   :  { %v1524_v8 = vmax.f32 %v1468_v30, 0.0  ;;  %v1460_v2 = vadd.f32 %v1691_v37, %v1459_v18 }
 0x200   :  { %v1991_v13 = vpop.f32.mrf.mxu0 }
 0x201   :  { %1540 = vst [vmem:[%s2844_s6 + $0x10] sm:$0xff] %v1524_v8  ;;  %v1522_v44 = vmax.f32 %v1460_v2, 0.0  ;;  %v1471_v46 = vadd.f32 %v1991_v13, %v1691_v37 }
 0x202   :  { %v1462_v15 = vpop.f32.mrf.mxu0 }
 0x203   :  { %1538 = vst [vmem:[%s2844_s6] sm:$0xff] %v1522_v44  ;;  %v1525_v25 = vmax.f32 %v1471_v46, 0.0  ;;  %v1463_v27 = vadd.f32 %v1691_v37, %v1462_v15 }
 0x205   :  { %1541 = vst [vmem:[%s2844_s6 + $0x18] sm:$0xff] %v1525_v25  ;;  %v1523_v59 = vmax.f32 %v1463_v27, 0.0 }
 0x207   :  { %1539 = vst [vmem:[%s2844_s6 + $0x8] sm:$0xff] %v1523_v59 }
 0x20c   :  { %v1994_v61 = vpop.f32.mrf.mxu0 }
 0x20d   :  { %v1484_v41 = vadd.f32 %v1994_v61, %v1691_v37 }
 0x20e   :  { %v1475_v43 = vpop.f32.mrf.mxu0 }
 0x20f   :  { %v1528_v4 = vmax.f32 %v1484_v41, 0.0  ;;  %v1476_v20 = vadd.f32 %v1691_v37, %v1475_v43 }
 0x210   :  { %v1995_v22 = vpop.f32.mrf.mxu0 }
 0x211   :  { %1544 = vst [vmem:[%s2844_s6 + $0x30] sm:$0xff] %v1528_v4  ;;  %v1526_v57 = vmax.f32 %v1476_v20, 0.0  ;;  %v1487_v32 = vadd.f32 %v1995_v22, %v1691_v37 }
 0x212   :  { %v1478_v34 = vpop.f32.mrf.mxu0 }
 0x213   :  { %1542 = vst [vmem:[%s2844_s6 + $0x20] sm:$0xff] %v1526_v57  ;;  %v1529_v48 = vmax.f32 %v1487_v32, 0.0  ;;  %v1479_v50 = vadd.f32 %v1691_v37, %v1478_v34 }
 0x215   :  { %1545 = vst [vmem:[%s2844_s6 + $0x38] sm:$0xff] %v1529_v48  ;;  %v1527_v62 = vmax.f32 %v1479_v50, 0.0 }
 0x217   :  { %1543 = vst [vmem:[%s2844_s6 + $0x28] sm:$0xff] %v1527_v62 }
 0x21c   :  { %v1998_v17 = vpop.f32.mrf.mxu1 }
 0x21d   :  { %v1500_v19 = vadd.f32 %v1998_v17, %v1691_v37 }
 0x21e   :  { %v1491_v45 = vpop.f32.mrf.mxu1 }
 0x21f   :  { %v1532_v47 = vmax.f32 %v1500_v19, 0.0  ;;  %v1492_v29 = vadd.f32 %v1691_v37, %v1491_v45 }
 0x220   :  { %v1999_v31 = vpop.f32.mrf.mxu1 }
 0x221   :  { %1548 = vst [vmem:[%s2844_s6 + $0x50] sm:$0xff] %v1532_v47  ;;  %v1530_v55 = vmax.f32 %v1492_v29, 0.0  ;;  %v1503_v60 = vadd.f32 %v1999_v31, %v1691_v37 }
 0x222   :  { %v1494_v0 = vpop.f32.mrf.mxu1 }
 0x223   :  { %1546 = vst [vmem:[%s2844_s6 + $0x40] sm:$0xff] %v1530_v55  ;;  %v1533_v52 = vmax.f32 %v1503_v60, 0.0  ;;  %v1495_v54 = vadd.f32 %v1691_v37, %v1494_v0 }
 0x225   :  { %1549 = vst [vmem:[%s2844_s6 + $0x58] sm:$0xff] %v1533_v52  ;;  %v1531_v6 = vmax.f32 %v1495_v54, 0.0 }
 0x227   :  { %1547 = vst [vmem:[%s2844_s6 + $0x48] sm:$0xff] %v1531_v6 }
 0x22c   :  { %v2002_v7 = vpop.f32.mrf.mxu1 }
 0x22d   :  { %v1516_v36 = vadd.f32 %v2002_v7, %v1691_v37 }
 0x22e   :  { %v1507_v38 = vpop.f32.mrf.mxu1 }
 0x22f   :  { %v1536_v12 = vmax.f32 %v1516_v36, 0.0  ;;  %v1508_v49 = vadd.f32 %v1691_v37, %v1507_v38 }
 0x230   :  { %v2003_v51 = vpop.f32.mrf.mxu1 }
 0x231   :  { %1552 = vst [vmem:[%s2844_s6 + $0x70] sm:$0xff] %v1536_v12  ;;  %v1534_v24 = vmax.f32 %v1508_v49, 0.0  ;;  %v1519_v26 = vadd.f32 %v2003_v51, %v1691_v37 }
 0x232   :  { %v1510_v14 = vpop.f32.mrf.mxu1 }
 0x233   :  { %1550 = vst [vmem:[%s2844_s6 + $0x60] sm:$0xff] %v1534_v24  ;;  %v1537_v3 = vmax.f32 %v1519_v26, 0.0  ;;  %v1511_v33 = vadd.f32 %v1691_v37, %v1510_v14 }
 0x235   :  { %1553 = vst [vmem:[%s2844_s6 + $0x78] sm:$0xff] %v1537_v3  ;;  %v1535_v35 = vmax.f32 %v1511_v33, 0.0 }
 0x237   :  { %1551 = vst [vmem:[%s2844_s6 + $0x68] sm:$0xff] %v1535_v35 }

</bundles_post_ra>
